<compile_context>
chip_gen: v5e
topology: v5e:2x2
jax: 0.10.0
libtpu: 0.0.40
codegen_flags: <defaults>
</compile_context>

<pallas_src>
import functools

import jax
import jax.numpy as jnp
import numpy as np
from jax import lax
from jax.experimental import pallas as pl
from jax.experimental.pallas import tpu as pltpu


# ----------------------------------------------------------------------------
# Small helpers
# ----------------------------------------------------------------------------
@functools.lru_cache(maxsize=None)
def _vmem_limit_bytes():
    """Scoped-VMEM limit derived from the running chip, with headroom."""
    try:
        cap = int(pltpu.get_tpu_info().vmem_capacity_bytes)
        return max(32 * 1024 * 1024, min(cap * 3 // 4, 128 * 1024 * 1024))
    except Exception:
        return 64 * 1024 * 1024


def _const_spec(shape, index_map):
    """BlockSpec for operands whose block index never changes across the grid.

    Single-buffered (pl.Buffered(1)) so resident weights are not held twice in
    VMEM.  Falls back to a plain BlockSpec if pipeline_mode is unavailable.
    """
    try:
        return pl.BlockSpec(shape, index_map, pipeline_mode=pl.Buffered(1))
    except TypeError:
        return pl.BlockSpec(shape, index_map)


def _pick_seq_tile(s):
    """Sequence tile: multiple of 16 (bf16 sublane pack), prefer >=2 tiles
    (keeps v7x's second TensorCore busy); fall back to a full-dim block."""
    candidates = (256, 128, 64, 32, 16)
    for c in candidates:
        if s % c == 0 and s // c >= 2:
            return c
    for c in candidates:
        if s % c == 0:
            return c
    return s


def _pick_inner_tile(i):
    for c in (512, 256, 128):
        if i % c == 0:
            return c
    return i


# ----------------------------------------------------------------------------
# Kernel 1: LayerNorm1 + fused QKV projection (head_dim padded to 128 lanes).
# ----------------------------------------------------------------------------
def ln_qkv_kernel(x_ref, ln1w_ref, ln1b_ref,
                  qw_ref, qb_ref, kw_ref, kb_ref, vw_ref, vb_ref,
                  q_ref, k_ref, v_ref, *, eps):
    x = x_ref[...].astype(jnp.float32)                       # (tq, H)
    mu = jnp.mean(x, axis=-1, keepdims=True)
    var = jnp.mean((x - mu) ** 2, axis=-1, keepdims=True)
    hb = ((x - mu) * lax.rsqrt(var + eps) * ln1w_ref[...]
          + ln1b_ref[...]).astype(jnp.bfloat16)

    q = jnp.dot(hb, qw_ref[...], preferred_element_type=jnp.float32) + qb_ref[...]
    k = jnp.dot(hb, kw_ref[...], preferred_element_type=jnp.float32) + kb_ref[...]
    v = jnp.dot(hb, vw_ref[...], preferred_element_type=jnp.float32) + vb_ref[...]

    q_ref[...] = q.astype(q_ref.dtype)
    k_ref[...] = k.astype(k_ref.dtype)
    v_ref[...] = v.astype(v_ref.dtype)


def siglip_ln_qkv(x, p, *, eps):
    B, S, H = x.shape
    Hp = p["q_w"].shape[1]
    tq = _pick_seq_tile(S)
    nq = S // tq

    kernel = functools.partial(ln_qkv_kernel, eps=eps)
    qkv_sds = jax.ShapeDtypeStruct((B, S, Hp), jnp.bfloat16)
    return pl.pallas_call(
        kernel,
        out_shape=(qkv_sds, qkv_sds, qkv_sds),
        grid=(B, nq),
        in_specs=[
            pl.BlockSpec((None, tq, H), lambda b, q: (b, q, 0)),   # x tile
            _const_spec((1, H), lambda b, q: (0, 0)),              # ln1 w
            _const_spec((1, H), lambda b, q: (0, 0)),              # ln1 b
            _const_spec((H, Hp), lambda b, q: (0, 0)),             # q_w (scale folded)
            _const_spec((1, Hp), lambda b, q: (0, 0)),             # q_b
            _const_spec((H, Hp), lambda b, q: (0, 0)),             # k_w
            _const_spec((1, Hp), lambda b, q: (0, 0)),             # k_b
            _const_spec((H, Hp), lambda b, q: (0, 0)),             # v_w
            _const_spec((1, Hp), lambda b, q: (0, 0)),             # v_b
        ],
        out_specs=(
            pl.BlockSpec((None, tq, Hp), lambda b, q: (b, q, 0)),
            pl.BlockSpec((None, tq, Hp), lambda b, q: (b, q, 0)),
            pl.BlockSpec((None, tq, Hp), lambda b, q: (b, q, 0)),
        ),
        compiler_params=pltpu.CompilerParams(
            dimension_semantics=("parallel", "parallel"),
            vmem_limit_bytes=_vmem_limit_bytes()),
    )(x, p["ln1_w"], p["ln1_b"], p["q_w"], p["q_b"],
      p["k_w"], p["k_b"], p["v_w"], p["v_b"])


# ----------------------------------------------------------------------------
# Kernel 2: attention core, one (batch, head, query-tile) block per grid step.
# ----------------------------------------------------------------------------
def attn_core_kernel(q_ref, k_ref, v_ref, ctx_ref):
    q = q_ref[...]                                            # (tq, hdp) bf16
    k = k_ref[...]                                            # (S,  hdp) bf16
    v = v_ref[...]                                            # (S,  hdp) bf16
    # scores = q @ k^T, f32 accumulation, no explicit transpose.
    s = lax.dot_general(q, k, (((1,), (1,)), ((), ())),
                        preferred_element_type=jnp.float32)   # (tq, S)
    m = jnp.max(s, axis=-1, keepdims=True)
    pexp = jnp.exp(s - m)
    denom = jnp.sum(pexp, axis=-1, keepdims=True)
    pexp = pexp * pl.reciprocal(denom, approx=True)           # EUP slot, not VPU div
    ctx_ref[...] = jnp.dot(pexp.astype(jnp.bfloat16), v,
                           preferred_element_type=jnp.float32).astype(ctx_ref.dtype)


def siglip_attention_core(q, k, v, *, num_heads):
    B, S, Hp = q.shape
    hdp = Hp // num_heads
    tq = _pick_seq_tile(S)
    nq = S // tq

    return pl.pallas_call(
        attn_core_kernel,
        out_shape=jax.ShapeDtypeStruct((B, S, Hp), jnp.bfloat16),
        grid=(B, num_heads, nq),
        in_specs=[
            pl.BlockSpec((None, tq, hdp), lambda b, h, qi: (b, qi, h)),
            pl.BlockSpec((None, S, hdp), lambda b, h, qi: (b, 0, h)),
            pl.BlockSpec((None, S, hdp), lambda b, h, qi: (b, 0, h)),
        ],
        out_specs=pl.BlockSpec((None, tq, hdp), lambda b, h, qi: (b, qi, h)),
        compiler_params=pltpu.CompilerParams(
            dimension_semantics=("parallel", "parallel", "parallel"),
            vmem_limit_bytes=_vmem_limit_bytes()),
    )(q, k, v)


# ----------------------------------------------------------------------------
# Kernel 3: fused output projection + residual + LayerNorm2 + MLP + residual.
# grid = (batch, seq-tiles, intermediate-tiles); last axis is a reduction.
# ----------------------------------------------------------------------------
def oproj_mlp_kernel(x_ref, ctx_ref, ow_ref, ob_ref, ln2w_ref, ln2b_ref,
                     f1w_ref, f1b_ref, f2w_ref, f2b_ref,
                     o_ref, hn_ref, acc_ref, *, eps):
    kstep = pl.program_id(2)

    @pl.when(kstep == 0)
    def _():
        attn = jnp.dot(ctx_ref[...], ow_ref[...],
                       preferred_element_type=jnp.float32) + ob_ref[...]
        xa = x_ref[...].astype(jnp.float32) + attn            # residual #1
        mu = jnp.mean(xa, axis=-1, keepdims=True)
        var = jnp.mean((xa - mu) ** 2, axis=-1, keepdims=True)
        hn_ref[...] = ((xa - mu) * lax.rsqrt(var + eps) * ln2w_ref[...]
                       + ln2b_ref[...]).astype(jnp.bfloat16)  # LN2 computed once
        acc_ref[...] = xa + f2b_ref[...]                      # residual #2 + fc2 bias

    h1 = jnp.dot(hn_ref[...], f1w_ref[...],
                 preferred_element_type=jnp.float32) + f1b_ref[...]   # (tS, tI)
    # gelu (tanh approximation) in f32.
    h1 = 0.5 * h1 * (1.0 + jnp.tanh(0.7978845608028654 *
                                    (h1 + 0.044715 * h1 * h1 * h1)))
    acc_ref[...] += jnp.dot(h1.astype(jnp.bfloat16), f2w_ref[...],
                            preferred_element_type=jnp.float32)

    @pl.when(kstep == pl.num_programs(2) - 1)
    def _():
        o_ref[...] = acc_ref[...].astype(o_ref.dtype)


def siglip_oproj_mlp(x, ctx, p, *, eps):
    B, S, H = x.shape
    Hp = ctx.shape[-1]
    I = p["fc1_w"].shape[1]
    tS = _pick_seq_tile(S)
    nS = S // tS
    tI = _pick_inner_tile(I)
    nK = I // tI

    kernel = functools.partial(oproj_mlp_kernel, eps=eps)
    return pl.pallas_call(
        kernel,
        out_shape=jax.ShapeDtypeStruct((B, S, H), x.dtype),
        grid=(B, nS, nK),
        in_specs=[
            pl.BlockSpec((None, tS, H), lambda b, s, k: (b, s, 0)),     # x (residual)
            pl.BlockSpec((None, tS, Hp), lambda b, s, k: (b, s, 0)),    # ctx (bf16)
            _const_spec((Hp, H), lambda b, s, k: (0, 0)),               # o_w
            _const_spec((1, H), lambda b, s, k: (0, 0)),                # o_b
            _const_spec((1, H), lambda b, s, k: (0, 0)),                # ln2 w
            _const_spec((1, H), lambda b, s, k: (0, 0)),                # ln2 b
            pl.BlockSpec((H, tI), lambda b, s, k: (0, k)),              # fc1_w tile
            pl.BlockSpec((1, tI), lambda b, s, k: (0, k)),              # fc1_b tile
            pl.BlockSpec((tI, H), lambda b, s, k: (k, 0)),              # fc2_w tile
            _const_spec((1, H), lambda b, s, k: (0, 0)),                # fc2_b
        ],
        out_specs=pl.BlockSpec((None, tS, H), lambda b, s, k: (b, s, 0)),
        scratch_shapes=[
            pltpu.VMEM((tS, H), jnp.bfloat16),   # LN2'd activation cache
            pltpu.VMEM((tS, H), jnp.float32),    # f32 accumulator
        ],
        compiler_params=pltpu.CompilerParams(
            dimension_semantics=("parallel", "parallel", "arbitrary"),
            vmem_limit_bytes=_vmem_limit_bytes()),
    )(x, ctx, p["o_w"], p["o_b"], p["ln2_w"], p["ln2_b"],
      p["fc1_w"], p["fc1_b"], p["fc2_w"], p["fc2_b"])


# ----------------------------------------------------------------------------
# Layer / encoder wrappers
# ----------------------------------------------------------------------------
def siglip_encoder_layer(x, p, *, num_heads, eps):
    q, k, v = siglip_ln_qkv(x, p, eps=eps)
    ctx = siglip_attention_core(q, k, v, num_heads=num_heads)
    return siglip_oproj_mlp(x, ctx, p, eps=eps)


def siglip_encoder(x, layer_params, *, num_heads, eps):
    h = x
    for p in layer_params:
        h = siglip_encoder_layer(h, p, num_heads=num_heads, eps=eps)
    return h


# ----------------------------------------------------------------------------
# Parameter prep: fold q scale, zero-pad head_dim to a multiple of 128, bf16.
# Padded q/k/v lanes are exactly zero and padded o_w rows are zero, so the
# padded head_dim is mathematically inert (scores / context unchanged).
# ----------------------------------------------------------------------------
def prepare_layer_params(raw, *, num_heads):
    H = raw["q_w"].shape[0]
    hd = H // num_heads
    hdp = ((hd + 127) // 128) * 128
    scale = float(hd) ** -0.5

    def pad_cols(w):                      # (H, H) -> (H, nh*hdp)
        w = w.reshape(H, num_heads, hd)
        w = jnp.pad(w, ((0, 0), (0, 0), (0, hdp - hd)))
        return w.reshape(H, num_heads * hdp)

    def pad_bias(b):                      # (1, H) -> (1, nh*hdp)
        b = b.reshape(1, num_heads, hd)
        b = jnp.pad(b, ((0, 0), (0, 0), (0, hdp - hd)))
        return b.reshape(1, num_heads * hdp)

    def pad_rows(w):                      # (H, H) -> (nh*hdp, H)
        w = w.reshape(num_heads, hd, H)
        w = jnp.pad(w, ((0, 0), (0, hdp - hd), (0, 0)))
        return w.reshape(num_heads * hdp, H)

    p = dict(raw)
    p["q_w"] = (pad_cols(raw["q_w"]) * scale).astype(jnp.bfloat16)
    p["q_b"] = pad_bias(raw["q_b"]) * scale
    p["k_w"] = pad_cols(raw["k_w"]).astype(jnp.bfloat16)
    p["k_b"] = pad_bias(raw["k_b"])
    p["v_w"] = pad_cols(raw["v_w"]).astype(jnp.bfloat16)
    p["v_b"] = pad_bias(raw["v_b"])
    p["o_w"] = pad_rows(raw["o_w"]).astype(jnp.bfloat16)
    p["fc1_w"] = raw["fc1_w"].astype(jnp.bfloat16)
    p["fc2_w"] = raw["fc2_w"].astype(jnp.bfloat16)
    return p


# ----------------------------------------------------------------------------
# Pure-JAX reference (same bf16-rounded, head-padded weights; f32 activations).
# ----------------------------------------------------------------------------
def reference_layer(x, p, *, num_heads, eps):
    B, S, H = x.shape
    Hp = p["q_w"].shape[1]
    hdp = Hp // num_heads
    f32 = lambda a: a.astype(jnp.float32)

    def ln(v, w, b):
        mu = jnp.mean(v, axis=-1, keepdims=True)
        var = jnp.mean((v - mu) ** 2, axis=-1, keepdims=True)
        return (v - mu) / jnp.sqrt(var + eps) * w + b

    res = x
    h = ln(x, p["ln1_w"], p["ln1_b"])
    q = h @ f32(p["q_w"]) + p["q_b"]          # 1/sqrt(hd) already folded in
    k = h @ f32(p["k_w"]) + p["k_b"]
    v = h @ f32(p["v_w"]) + p["v_b"]
    q = q.reshape(B, S, num_heads, hdp).transpose(0, 2, 1, 3)
    k = k.reshape(B, S, num_heads, hdp).transpose(0, 2, 1, 3)
    v = v.reshape(B, S, num_heads, hdp).transpose(0, 2, 1, 3)
    s = jnp.einsum("bhqd,bhkd->bhqk", q, k)
    pr = jax.nn.softmax(s, axis=-1)
    ctx = jnp.einsum("bhqk,bhkd->bhqd", pr, v).transpose(0, 2, 1, 3).reshape(B, S, Hp)
    x1 = res + (ctx @ f32(p["o_w"]) + p["o_b"])

    res2 = x1
    h2 = ln(x1, p["ln2_w"], p["ln2_b"])
    h2 = h2 @ f32(p["fc1_w"]) + p["fc1_b"]
    h2 = 0.5 * h2 * (1.0 + jnp.tanh(0.7978845608028654 * (h2 + 0.044715 * h2 ** 3)))
    h2 = h2 @ f32(p["fc2_w"]) + p["fc2_b"]
    return res2 + h2


def reference_encoder(x, layer_params, *, num_heads, eps):
    h = x
    for p in layer_params:
        h = reference_layer(h, p, num_heads=num_heads, eps=eps)
    return h


# ----------------------------------------------------------------------------
# Deterministic parameter init (synthetic; shapes from SiglipVisionConfig).
# ----------------------------------------------------------------------------
def init_layer_params(key, hidden, intermediate):
    ks = jax.random.split(key, 16)
    std = 0.02
    n = lambda k, shape, s=std: jax.random.normal(k, shape, jnp.float32) * s
    return {
        "ln1_w": 1.0 + n(ks[0], (1, hidden), 0.05),
        "ln1_b": n(ks[1], (1, hidden), 0.05),
        "q_w": n(ks[2], (hidden, hidden)),
        "q_b": n(ks[3], (1, hidden)),
        "k_w": n(ks[4], (hidden, hidden)),
        "k_b": n(ks[5], (1, hidden)),
        "v_w": n(ks[6], (hidden, hidden)),
        "v_b": n(ks[7], (1, hidden)),
        "o_w": n(ks[8], (hidden, hidden)),
        "o_b": n(ks[9], (1, hidden)),
        "ln2_w": 1.0 + n(ks[10], (1, hidden), 0.05),
        "ln2_b": n(ks[11], (1, hidden), 0.05),
        "fc1_w": n(ks[12], (hidden, intermediate)),
        "fc1_b": n(ks[13], (1, intermediate)),
        "fc2_w": n(ks[14], (intermediate, hidden)),
        "fc2_b": n(ks[15], (1, hidden)),
    }


if __name__ == "__main__":
    # Small SiglipVisionConfig-consistent sizes.
    B, S = 2, 32            # batch, number of image tokens
    HIDDEN = 32
    INTERMEDIATE = 64
    N_LAYERS = 2
    N_HEADS = 4
    EPS = 1e-9

    root = jax.random.PRNGKey(0)
    x_key, *layer_keys = jax.random.split(root, N_LAYERS + 1)

    x = jax.random.normal(x_key, (B, S, HIDDEN), jnp.float32)
    raw_params = [init_layer_params(k, HIDDEN, INTERMEDIATE) for k in layer_keys]
    layer_params = [prepare_layer_params(p, num_heads=N_HEADS) for p in raw_params]

    out = siglip_encoder(x, layer_params, num_heads=N_HEADS, eps=EPS)
    out = jax.block_until_ready(out)

    ref = reference_encoder(x, layer_params, num_heads=N_HEADS, eps=EPS)
    np.testing.assert_allclose(np.asarray(out), np.asarray(ref),
                               atol=2e-2, rtol=2e-2)

    print("KERNEL_OK")
</pallas_src>

<mosaic_0001>
module attributes {stable_mosaic.version = 11 : i64} {
  func.func @ln_qkv_kernel(%arg0: i32, %arg1: i32, %arg2: memref<1x16x32xf32, #tpu.memory_space<vmem>>, %arg3: memref<1x32xf32, #tpu.memory_space<vmem>>, %arg4: memref<1x32xf32, #tpu.memory_space<vmem>>, %arg5: memref<32x512xbf16, #tpu.memory_space<vmem>>, %arg6: memref<1x512xf32, #tpu.memory_space<vmem>>, %arg7: memref<32x512xbf16, #tpu.memory_space<vmem>>, %arg8: memref<1x512xf32, #tpu.memory_space<vmem>>, %arg9: memref<32x512xbf16, #tpu.memory_space<vmem>>, %arg10: memref<1x512xf32, #tpu.memory_space<vmem>>, %arg11: memref<1x16x512xbf16, #tpu.memory_space<vmem>>, %arg12: memref<1x16x512xbf16, #tpu.memory_space<vmem>>, %arg13: memref<1x16x512xbf16, #tpu.memory_space<vmem>>) attributes {dimension_semantics = [#tpu.dimension_semantics<parallel>, #tpu.dimension_semantics<parallel>], iteration_bounds = array<i64: 2, 2>, scalar_prefetch = 0 : i64, scratch_operands = 0 : i64, tpu.core_type = #tpu.core_type<tc>, window_params = [{transform_indices = @transform_0, window_bounds = array<i64: 1, 16, 32>}, {pipeline_mode = #tpu.pipeline_mode<synchronous>, transform_indices = @transform_1, window_bounds = array<i64: 1, 32>}, {pipeline_mode = #tpu.pipeline_mode<synchronous>, transform_indices = @transform_2, window_bounds = array<i64: 1, 32>}, {pipeline_mode = #tpu.pipeline_mode<synchronous>, transform_indices = @transform_3, window_bounds = array<i64: 32, 512>}, {pipeline_mode = #tpu.pipeline_mode<synchronous>, transform_indices = @transform_4, window_bounds = array<i64: 1, 512>}, {pipeline_mode = #tpu.pipeline_mode<synchronous>, transform_indices = @transform_5, window_bounds = array<i64: 32, 512>}, {pipeline_mode = #tpu.pipeline_mode<synchronous>, transform_indices = @transform_6, window_bounds = array<i64: 1, 512>}, {pipeline_mode = #tpu.pipeline_mode<synchronous>, transform_indices = @transform_7, window_bounds = array<i64: 32, 512>}, {pipeline_mode = #tpu.pipeline_mode<synchronous>, transform_indices = @transform_8, window_bounds = array<i64: 1, 512>}, {transform_indices = @transform_9, window_bounds = array<i64: 1, 16, 512>}, {transform_indices = @transform_10, window_bounds = array<i64: 1, 16, 512>}, {transform_indices = @transform_11, window_bounds = array<i64: 1, 16, 512>}]} {
    %c0 = arith.constant 0 : index
    %c0_0 = arith.constant 0 : index
    %c0_1 = arith.constant 0 : index
    %0 = vector.load %arg2[%c0, %c0_0, %c0_1] : memref<1x16x32xf32, #tpu.memory_space<vmem>>, vector<1x16x32xf32>
    %1 = vector.shape_cast %0 : vector<1x16x32xf32> to vector<16x32xf32>
    %cst = arith.constant dense<0.000000e+00> : vector<16xf32>
    %2 = vector.multi_reduction <add>, %1, %cst [1] : vector<16x32xf32> to vector<16xf32>
    %3 = vector.shape_cast %2 : vector<16xf32> to vector<16x1xf32>
    %cst_2 = arith.constant 3.200000e+01 : f32
    %4 = vector.broadcast %cst_2 : f32 to vector<16x1xf32>
    %5 = arith.divf %3, %4 : vector<16x1xf32>
    %6 = vector.broadcast %5 : vector<16x1xf32> to vector<16x32xf32>
    %7 = arith.subf %1, %6 : vector<16x32xf32>
    %8 = arith.mulf %7, %7 : vector<16x32xf32>
    %cst_3 = arith.constant dense<0.000000e+00> : vector<16xf32>
    %9 = vector.multi_reduction <add>, %8, %cst_3 [1] : vector<16x32xf32> to vector<16xf32>
    %10 = vector.shape_cast %9 : vector<16xf32> to vector<16x1xf32>
    %cst_4 = arith.constant 3.200000e+01 : f32
    %11 = vector.broadcast %cst_4 : f32 to vector<16x1xf32>
    %12 = arith.divf %10, %11 : vector<16x1xf32>
    %13 = vector.broadcast %5 : vector<16x1xf32> to vector<16x32xf32>
    %14 = arith.subf %1, %13 : vector<16x32xf32>
    %cst_5 = arith.constant 9.99999971E-10 : f32
    %15 = vector.broadcast %cst_5 : f32 to vector<16x1xf32>
    %16 = arith.addf %12, %15 : vector<16x1xf32>
    %17 = math.rsqrt %16 : vector<16x1xf32>
    %18 = vector.broadcast %17 : vector<16x1xf32> to vector<16x32xf32>
    %19 = arith.mulf %14, %18 : vector<16x32xf32>
    %c0_6 = arith.constant 0 : index
    %c0_7 = arith.constant 0 : index
    %20 = vector.load %arg3[%c0_6, %c0_7] : memref<1x32xf32, #tpu.memory_space<vmem>>, vector<1x32xf32>
    %21 = vector.broadcast %20 : vector<1x32xf32> to vector<16x32xf32>
    %22 = arith.mulf %19, %21 : vector<16x32xf32>
    %c0_8 = arith.constant 0 : index
    %c0_9 = arith.constant 0 : index
    %23 = vector.load %arg4[%c0_8, %c0_9] : memref<1x32xf32, #tpu.memory_space<vmem>>, vector<1x32xf32>
    %24 = vector.broadcast %23 : vector<1x32xf32> to vector<16x32xf32>
    %25 = arith.addf %22, %24 : vector<16x32xf32>
    %26 = arith.truncf %25 : vector<16x32xf32> to vector<16x32xbf16>
    %c0_10 = arith.constant 0 : index
    %c0_11 = arith.constant 0 : index
    %27 = vector.load %arg5[%c0_10, %c0_11] : memref<32x512xbf16, #tpu.memory_space<vmem>>, vector<32x512xbf16>
    %cst_12 = arith.constant dense<0.000000e+00> : vector<16x512xf32>
    %28 = tpu.matmul %26, %27, %cst_12 {dimension_numbers = #tpu.dot_dimension_numbers<[1], [0], [0], [1], [0, 0, 1, 1], [], []>} : vector<16x32xbf16>, vector<32x512xbf16>, vector<16x512xf32> -> vector<16x512xf32>
    %c0_13 = arith.constant 0 : index
    %c0_14 = arith.constant 0 : index
    %29 = vector.load %arg6[%c0_13, %c0_14] : memref<1x512xf32, #tpu.memory_space<vmem>>, vector<1x512xf32>
    %30 = vector.broadcast %29 : vector<1x512xf32> to vector<16x512xf32>
    %31 = arith.addf %28, %30 : vector<16x512xf32>
    %c0_15 = arith.constant 0 : index
    %c0_16 = arith.constant 0 : index
    %32 = vector.load %arg7[%c0_15, %c0_16] : memref<32x512xbf16, #tpu.memory_space<vmem>>, vector<32x512xbf16>
    %cst_17 = arith.constant dense<0.000000e+00> : vector<16x512xf32>
    %33 = tpu.matmul %26, %32, %cst_17 {dimension_numbers = #tpu.dot_dimension_numbers<[1], [0], [0], [1], [0, 0, 1, 1], [], []>} : vector<16x32xbf16>, vector<32x512xbf16>, vector<16x512xf32> -> vector<16x512xf32>
    %c0_18 = arith.constant 0 : index
    %c0_19 = arith.constant 0 : index
    %34 = vector.load %arg8[%c0_18, %c0_19] : memref<1x512xf32, #tpu.memory_space<vmem>>, vector<1x512xf32>
    %35 = vector.broadcast %34 : vector<1x512xf32> to vector<16x512xf32>
    %36 = arith.addf %33, %35 : vector<16x512xf32>
    %c0_20 = arith.constant 0 : index
    %c0_21 = arith.constant 0 : index
    %37 = vector.load %arg9[%c0_20, %c0_21] : memref<32x512xbf16, #tpu.memory_space<vmem>>, vector<32x512xbf16>
    %cst_22 = arith.constant dense<0.000000e+00> : vector<16x512xf32>
    %38 = tpu.matmul %26, %37, %cst_22 {dimension_numbers = #tpu.dot_dimension_numbers<[1], [0], [0], [1], [0, 0, 1, 1], [], []>} : vector<16x32xbf16>, vector<32x512xbf16>, vector<16x512xf32> -> vector<16x512xf32>
    %c0_23 = arith.constant 0 : index
    %c0_24 = arith.constant 0 : index
    %39 = vector.load %arg10[%c0_23, %c0_24] : memref<1x512xf32, #tpu.memory_space<vmem>>, vector<1x512xf32>
    %40 = vector.broadcast %39 : vector<1x512xf32> to vector<16x512xf32>
    %41 = arith.addf %38, %40 : vector<16x512xf32>
    %42 = arith.truncf %31 : vector<16x512xf32> to vector<16x512xbf16>
    %c0_25 = arith.constant 0 : index
    %c0_26 = arith.constant 0 : index
    %c0_27 = arith.constant 0 : index
    %43 = vector.load %arg11[%c0_25, %c0_26, %c0_27] : memref<1x16x512xbf16, #tpu.memory_space<vmem>>, vector<1x16x512xbf16>
    %44 = vector.shape_cast %43 : vector<1x16x512xbf16> to vector<16x512xbf16>
    %45 = vector.shape_cast %42 : vector<16x512xbf16> to vector<1x16x512xbf16>
    tpu.vector_store %arg11[%c0_25, %c0_26, %c0_27], %45 {strides = array<i32>} : memref<1x16x512xbf16, #tpu.memory_space<vmem>>, vector<1x16x512xbf16>,
    %46 = arith.truncf %36 : vector<16x512xf32> to vector<16x512xbf16>
    %c0_28 = arith.constant 0 : index
    %c0_29 = arith.constant 0 : index
    %c0_30 = arith.constant 0 : index
    %47 = vector.load %arg12[%c0_28, %c0_29, %c0_30] : memref<1x16x512xbf16, #tpu.memory_space<vmem>>, vector<1x16x512xbf16>
    %48 = vector.shape_cast %47 : vector<1x16x512xbf16> to vector<16x512xbf16>
    %49 = vector.shape_cast %46 : vector<16x512xbf16> to vector<1x16x512xbf16>
    tpu.vector_store %arg12[%c0_28, %c0_29, %c0_30], %49 {strides = array<i32>} : memref<1x16x512xbf16, #tpu.memory_space<vmem>>, vector<1x16x512xbf16>,
    %50 = arith.truncf %41 : vector<16x512xf32> to vector<16x512xbf16>
    %c0_31 = arith.constant 0 : index
    %c0_32 = arith.constant 0 : index
    %c0_33 = arith.constant 0 : index
    %51 = vector.load %arg13[%c0_31, %c0_32, %c0_33] : memref<1x16x512xbf16, #tpu.memory_space<vmem>>, vector<1x16x512xbf16>
    %52 = vector.shape_cast %51 : vector<1x16x512xbf16> to vector<16x512xbf16>
    %53 = vector.shape_cast %50 : vector<16x512xbf16> to vector<1x16x512xbf16>
    tpu.vector_store %arg13[%c0_31, %c0_32, %c0_33], %53 {strides = array<i32>} : memref<1x16x512xbf16, #tpu.memory_space<vmem>>, vector<1x16x512xbf16>,
    return
  }
  func.func @transform_0(%arg0: i32, %arg1: i32) -> (i32, i32, i32) {
    %c0_i32 = arith.constant 0 : i32
    %c0_i32_0 = arith.constant 0 : i32
    return %arg0, %arg1, %c0_i32 : i32, i32, i32
  }
  func.func @transform_1(%arg0: i32, %arg1: i32) -> (i32, i32) {
    %c0_i32 = arith.constant 0 : i32
    %c0_i32_0 = arith.constant 0 : i32
    %c0_i32_1 = arith.constant 0 : i32
    return %c0_i32, %c0_i32_0 : i32, i32
  }
  func.func @transform_2(%arg0: i32, %arg1: i32) -> (i32, i32) {
    %c0_i32 = arith.constant 0 : i32
    %c0_i32_0 = arith.constant 0 : i32
    %c0_i32_1 = arith.constant 0 : i32
    return %c0_i32, %c0_i32_0 : i32, i32
  }
  func.func @transform_3(%arg0: i32, %arg1: i32) -> (i32, i32) {
    %c0_i32 = arith.constant 0 : i32
    %c0_i32_0 = arith.constant 0 : i32
    %c0_i32_1 = arith.constant 0 : i32
    return %c0_i32, %c0_i32_0 : i32, i32
  }
  func.func @transform_4(%arg0: i32, %arg1: i32) -> (i32, i32) {
    %c0_i32 = arith.constant 0 : i32
    %c0_i32_0 = arith.constant 0 : i32
    %c0_i32_1 = arith.constant 0 : i32
    return %c0_i32, %c0_i32_0 : i32, i32
  }
  func.func @transform_5(%arg0: i32, %arg1: i32) -> (i32, i32) {
    %c0_i32 = arith.constant 0 : i32
    %c0_i32_0 = arith.constant 0 : i32
    %c0_i32_1 = arith.constant 0 : i32
    return %c0_i32, %c0_i32_0 : i32, i32
  }
  func.func @transform_6(%arg0: i32, %arg1: i32) -> (i32, i32) {
    %c0_i32 = arith.constant 0 : i32
    %c0_i32_0 = arith.constant 0 : i32
    %c0_i32_1 = arith.constant 0 : i32
    return %c0_i32, %c0_i32_0 : i32, i32
  }
  func.func @transform_7(%arg0: i32, %arg1: i32) -> (i32, i32) {
    %c0_i32 = arith.constant 0 : i32
    %c0_i32_0 = arith.constant 0 : i32
    %c0_i32_1 = arith.constant 0 : i32
    return %c0_i32, %c0_i32_0 : i32, i32
  }
  func.func @transform_8(%arg0: i32, %arg1: i32) -> (i32, i32) {
    %c0_i32 = arith.constant 0 : i32
    %c0_i32_0 = arith.constant 0 : i32
    %c0_i32_1 = arith.constant 0 : i32
    return %c0_i32, %c0_i32_0 : i32, i32
  }
  func.func @transform_9(%arg0: i32, %arg1: i32) -> (i32, i32, i32) {
    %c0_i32 = arith.constant 0 : i32
    %c0_i32_0 = arith.constant 0 : i32
    return %arg0, %arg1, %c0_i32 : i32, i32, i32
  }
  func.func @transform_10(%arg0: i32, %arg1: i32) -> (i32, i32, i32) {
    %c0_i32 = arith.constant 0 : i32
    %c0_i32_0 = arith.constant 0 : i32
    return %arg0, %arg1, %c0_i32 : i32, i32, i32
  }
  func.func @transform_11(%arg0: i32, %arg1: i32) -> (i32, i32, i32) {
    %c0_i32 = arith.constant 0 : i32
    %c0_i32_0 = arith.constant 0 : i32
    return %arg0, %arg1, %c0_i32 : i32, i32, i32
  }
}

</mosaic_0001>

<bundles_post_ra>
// kernel: tpu_custom_call.1
= control target key start
LH: loop header
LB: loop body
LE: loop exit
PB: predicated region body
PF: predicated region fallthrough
CT: control target
= control target key end

     0   :  { %s2391_s0 = inlined_call_operand.hbm [shape: f32[2,32,32], index: 0, kind: input, shape index: {}]   ;;  %s2392_s1 = inlined_call_operand.hbm [shape: f32[1,32], index: 1, kind: input, shape index: {}]   ;;  %s2393_s2 = inlined_call_operand.vmem [shape: f32[1,32], index: 2, kind: input, shape index: {}]   ;;  %s2394_s3 = inlined_call_operand.hbm [shape: bf16[32,512], index: 3, kind: input, shape index: {}]   ;;  %s2395_s4 = inlined_call_operand.hbm [shape: f32[1,512], index: 4, kind: input, shape index: {}]   ;;  %s2396_s5 = inlined_call_operand.hbm [shape: bf16[32,512], index: 5, kind: input, shape index: {}]   ;;  %s2397_s6 = inlined_call_operand.vmem [shape: f32[1,512], index: 6, kind: input, shape index: {}]   ;;  %s2398_s7 = inlined_call_operand.hbm [shape: bf16[32,512], index: 7, kind: input, shape index: {}]   ;;  %s2399_s8 = inlined_call_operand.hbm [shape: f32[1,512], index: 8, kind: input, shape index: {}]   ;;  %s2400_s9 = inlined_call_operand.hbm [shape: bf16[2,32,512], index: 9, kind: output, shape index: {0}]   ;;  %s2401_s10 = inlined_call_operand.hbm [shape: bf16[2,32,512], index: 10, kind: output, shape index: {1}]   ;;  %s2402_s11 = inlined_call_operand.hbm [shape: bf16[2,32,512], index: 11, kind: output, shape index: {2}]  }
   0x1   :  { %2410 = sst [smem:[#allocation27_spill]] %s2392_s1 }
   0x2   :  { %2411 = sst [smem:[#allocation28_spill]] %s2394_s3 }
   0x3   :  { %2412 = sst [smem:[#allocation29_spill]] %s2395_s4 }
   0x4   :  { %2413 = sst [smem:[#allocation30_spill]] %s2396_s5 }
   0x5   :  { %2414 = sst [smem:[#allocation31_spill]] %s2397_s6 }
   0x6   :  { %2415 = sst [smem:[#allocation32_spill]] %s2398_s7 }
   0x7   :  { %2416 = sst [smem:[#allocation33_spill]] %s2399_s8 }
   0x8   :  { %2417 = sst [smem:[#allocation34_spill]] %s2400_s9 }
   0x9   :  { %2418 = sst [smem:[#allocation35_spill]] %s2401_s10 }
   0xa   :  { %2419 = sst [smem:[#allocation36_spill]] %s2402_s11 }
   0xb   :  { %17 = vsyncpa [#allocation3], 0 }
   0xc   :  { %19 = vsyncpa [#allocation3 + $0x1], 0 }
   0xd   :  { %20 = vsyncpa [#allocation6], 0 }
   0xe   :  { %21 = vsyncpa [#allocation9], 0 }
   0xf   :  { %22 = vsyncpa [#allocation12], 0 }
  0x10   :  { %23 = vsyncpa [#allocation4], 0 }
  0x11   :  { %25 = vsyncpa [#allocation4 + $0x1], 0 }
  0x12   :  { %26 = vsyncpa [#allocation16], 0 }
  0x13   :  { %28 = vsyncpa [#allocation16 + $0x1], 0  ;;  %s2062_s17 = smov 0   ;;  %s2064_s18 = smov 0  }
  0x14   :  { %s2066_s19 = smov 0   ;;  %s2068_s20 = smov 0  }
  0x15   :  { %s2070_s21 = smov 0   ;;  %s2072_s22 = smov 0  }
  0x16   :  { %s2074_s23 = smov 0   ;;  %s2076_s24 = smov 0  }
  0x17 LB: > { %2420 = sst [smem:[#allocation24_spill]] %s1979_s22  ;;  %s2103_s25 = sadd.s32 4294967295, %s1987_s24   ;;  %s1987_s24 = sphi %s2076_s24, %s34_s24   ;;  %s1983_s23 = sphi %s2074_s23, %s2447_s23   ;;  %s1979_s22 = sphi %s2072_s22, %s2441_s22   ;;  %s1975_s21 = sphi %s2070_s21, %s2446_s21   ;;  %s1971_s20 = sphi %s2068_s20, %s2440_s20   ;;  %s1967_s19 = sphi %s2066_s19, %s2445_s19   ;;  %s1963_s18 = sphi %s2064_s18, %s2444_s18   ;;  %s1959_s17 = sphi %s2062_s17, %s2443_s17  }
  0x18   : > { %p1268_p0 = scmp.ge.s32.totalorder %s1987_s24, 1  ;;  %p69_p1 = scmp.eq.s32.totalorder %s2103_s25, 0 }
  0x19   : > { %p331_p2 = scmp.lt.s32.totalorder %s1987_s24, 5  ;;  %s2421_s1 = sld [smem:[#allocation27_spill]] }
  0x1a   : > { %s1989_s30 = smov [#allocation5]   ;;  %s2423_s4 = sld [smem:[#allocation29_spill]] }
  0x1b   : > { %p2111_p3 = pnand %p1268_p0, %p331_p2  ;;  %s345_s12 = sshll.u32 %s1989_s30, 4  ;;  %s346_s12 = int_to_ptr.vmem [resolvable:$true] %s345_s12 }
  0x1c   : > { %s1990_s26 = smov [#allocation8]   ;;  %s2425_s7 = sld [smem:[#allocation32_spill]] }
  0x1d   : > { %p1475_p4 = pneg %p2111_p3  ;;  %s374_s27 = sshll.u32 %s1990_s26, 4  ;;  %s375_s27 = int_to_ptr.vmem [resolvable:$true] %s374_s27 }
  0x1e   : > { %s1991_s14 = smov [#allocation11]   ;;  %s2426_s3 = sld [smem:[#allocation28_spill]] }
  0x1f   : > { %s343_s28 = sshll.u32 %s2421_s1, 4  ;;  %p2122_p5 = pnand %p1475_p4, %p69_p1  ;;  %s344_s28 = int_to_ptr.hbm [resolvable:$true] %s343_s28 }
  0x20   : > { %s372_s15 = sshll.u32 %s2423_s4, 4  ;;  %s402_s4 = sshll.u32 %s1991_s14, 4  ;;  %s373_s15 = int_to_ptr.hbm [resolvable:$true] %s372_s15  ;;  %s403_s4 = int_to_ptr.vmem [resolvable:$true] %s402_s4 }
  0x21   : > { %1478 = dma.hbm_to_vmem [thread:$0]  (!%p2122_p5), %s344_s28, 16, %s346_s12, [#allocation6]  }
  0x22   : > { %1484 = dma.hbm_to_vmem [thread:$0]  (!%p2122_p5), %s373_s15, 64, %s375_s27, [#allocation9]  }
  0x23   : > { %s400_s13 = sshll.u32 %s2425_s7, 4  ;;  %s1992_s26 = smov 256   ;;  %s401_s13 = int_to_ptr.hbm [resolvable:$true] %s400_s13 }
  0x24   : > { %s357_s9 = sshll.u32 %s2426_s3, 4  ;;  %s1993_s6 = smov 16   ;;  %s358_s9 = int_to_ptr.hbm [resolvable:$true] %s357_s9 }
  0x25   : > { %1490 = dma.hbm_to_vmem [thread:$0]  (!%p2122_p5), %s401_s13, 1024, %s403_s4, [#allocation12], %s1992_s26, %s1992_s26, %s1993_s6  }
  0x26   : > { %s1994_s28 = smov [#allocation7]   ;;  %s2427_s5 = sld [smem:[#allocation30_spill]] }
  0x27   : > { %s359_s1 = sshll.u32 %s1994_s28, 4  ;;  %s2428_s8 = sld [smem:[#allocation33_spill]]  ;;  %s360_s1 = int_to_ptr.vmem [resolvable:$true] %s359_s1 }
  0x28   : > { %1481 = dma.hbm_to_vmem [thread:$0]  (!%p2122_p5), %s358_s9, 1024, %s360_s1, [#allocation6], %s1992_s26, %s1992_s26, %s1993_s6  }
  0x29   : > { %s1995_s30 = smov [#allocation10]   ;;  %s1996_s14 = smov [#allocation13]  }
  0x2a   : > { %s385_s13 = sshll.u32 %s1995_s30, 4  ;;  %s417_s28 = sshll.u32 %s1996_s14, 4  ;;  %s386_s13 = int_to_ptr.vmem [resolvable:$true] %s385_s13  ;;  %s418_s28 = int_to_ptr.vmem [resolvable:$true] %s417_s28 }
  0x2b   : > { %s2407_s9 = sadd.s32 4294967294, %s1987_s24   ;;  %s43_s1 = sadd.s32 1, %s1979_s22 }
  0x2c   : > { %s383_s27 = sshll.u32 %s2427_s5, 4  ;;  %p44_p6 = scmp.ge.s32.totalorder %s43_s1, 2  ;;  %s384_s27 = int_to_ptr.hbm [resolvable:$true] %s383_s27 }
  0x2d   : > { %s415_s4 = sshll.u32 %s2428_s8, 4  ;;  %s46_s12 = sadd.s32 1, %s1983_s23  ;;  %s416_s4 = int_to_ptr.hbm [resolvable:$true] %s415_s4 }
  0x2e   : > { %1487 = dma.hbm_to_vmem [thread:$0]  (!%p2122_p5), %s384_s27, 1024, %s386_s13, [#allocation9], %s1992_s26, %s1992_s26, %s1993_s6  }
  0x2f   : > { %1493 = dma.hbm_to_vmem [thread:$0]  (!%p2122_p5), %s416_s4, 64, %s418_s28, [#allocation12]  }
  0x30   : > { %s55_s15 = sadd.s32 1, %s1967_s19  ;;  %p62_p7 = scmp.ne.s32.totalorder %s1967_s19, %s1963_s18 }
  0x31   : > { %s2449_s1 = smov (%p44_p6, %s43_s1), 0  ;;  %s2451_s12 = smov (!%p44_p6, %s46_s12), %s1983_s23 }
  0x32   : > { %2429 = sst [smem:[#allocation25_spill]] %s2449_s1  ;;  %s51_s6 = ssub.s32 %s1979_s22, %s2449_s1 }
  0x33   : > { %p63_p8 = scmp.eq.s32.totalorder %s1987_s24, 0  ;;  %p48_p9 = scmp.ge.s32.totalorder %s2451_s12, 2 }
  0x34   : > { %p68_p10 = scmp.ne.s32.totalorder %s1963_s18, %s1959_s17  ;;  %p262_p12 = scmp.eq.s32.totalorder %s2103_s25, 3 }
  0x35   : > { %p2164_p11 = por %p63_p8, %p62_p7  ;;  %s2453_s12 = smov (%p48_p9, %s2451_s12), 0 }
  0x36   : > { %2431 = sst [smem:[#allocation26_spill]] %s2453_s12  ;;  %p2173_p13 = por %p69_p1, %p68_p10 }
  0x37   : > { %p2177_p0 = por %p262_p12, %p62_p7  ;;  %s50_s10 = ssub.s32 %s1983_s23, %s2453_s12 }
  0x38   : > { %p268_p2 = scmp.eq.s32.totalorder %s2407_s9, 3  ;;  %s52_s11 = sor.u32 %s51_s6, %s50_s10 }
  0x39   : > { %p1514_p4 = scmp.lt.s32.totalorder %s1987_s24, 4  ;;  %p53_p5 = scmp.eq.s32.totalorder %s52_s11, 0 }
  0x3a   : > { %p2186_p6 = por %p268_p2, %p68_p10  ;;  %s428_s30 = sand.u32 1, %s1967_s19  }
  0x3b   : > { %s1277_s13 = sshll.u32 %s1979_s22, 1  ;;  %s1276_s28 = sshll.u32 %s428_s30, 4 }
  0x3c   : > { %s2193_s14 = scalar_select %p53_p5, %s1967_s19, %s55_s15  }
  0x3d   : > { %s1278_s3 = sshll.u32 %s1983_s23, 2  ;;  %s432_s7 = scalar_lea.vmem [#allocation2], %s1276_s28 }
  0x3e   : > { %s437_s5 = sadd.s32 %s1278_s3, %s1277_s13  ;;  %s442_s8 = sshll.u32 %s432_s7, 4  ;;  %s443_s8 = int_to_ptr.vmem [resolvable:$true] %s442_s8 }
  0x3f   : > { %s1279_s12 = sshll.u32 %s437_s5, 3  ;;  %p1495_p7 = pnand %p1514_p4, %p2164_p11 }
  0x40   : > { %s439_s6 = scalar_lea.hbm %s2391_s0, %s1279_s12  ;;  %s429_s11 = scalar_lea.sflag [#allocation3], %s428_s30 }
  0x41   : > { %s440_s10 = sshll.u32 %s439_s6, 4  ;;  %s1997_s22 = smov 128   ;;  %s441_s10 = int_to_ptr.hbm [resolvable:$true] %s440_s10 }
  0x42   : > { %s1998_s15 = smov 8   ;;  %454 = sbr.rel (%p2111_p3) target bundleno = 552 (0x228), region = 56 }
  0x43   : > { %1497 = dma.hbm_to_vmem [thread:$0]  (!%p1495_p7), %s441_s10, 256, %s443_s8, %s429_s11, %s1997_s22, %s1997_s22, %s1998_s15  }
  0x44   : > { %s2206_s3 = sand.u32 (!%p2111_p3), 1, %s1963_s18  }
  0x45   : > { %s1281_s5 = sshll.u32 (!%p2111_p3), %s2206_s3, 4  ;;  %s457_s7 = scalar_lea.sflag (!%p2111_p3), [#allocation3], %s2206_s3 }
  0x46   : > { %s460_s9 = scalar_lea.vmem (!%p2111_p3), [#allocation2], %s1281_s5 }
  0x47   : > { %1934 = dma.done.wait (%p2173_p13), %s457_s7, 256  }
  0x48   : > { %1936 = vsyncadd (%p2173_p13), %s457_s7, 4294967040 }
  0x49   : > { %1938 = dma.done.wait (%p69_p1), [#allocation6], 1040  }
  0x4a   : > { %1940 = vsyncadd (%p69_p1), [#allocation6], 4294966256 }
  0x4b   : > { %1942 = dma.done.wait (%p69_p1), [#allocation9], 1088  }
  0x4c   : > { %1944 = vsyncadd (%p69_p1), [#allocation9], 4294966208 }
  0x4d   : > { %1946 = dma.done.wait (%p69_p1), [#allocation12], 1088  }
  0x4e   : > { %1948 = vsyncadd (%p69_p1), [#allocation12], 4294966208  ;;  %vm547_vm0 = vcmask 261120   ;;  %v545_v0 = vld [vmem:[%s460_s9] sm:$0xff]  ;;  %v546_v2 = vld [vmem:[%s460_s9 + $0x8] sm:$0xff]  ;;  %v1999_v4 = vmov 32.0  }
  0x4f   : > { %v548_v1 = vsel %vm547_vm0, %v545_v0, 0.0  ;;  %v551_v3 = vsel %vm547_vm0, %v546_v2, 0.0  ;;  %1601 = vrcp.f32 %v1999_v4  ;;  %v1309_v21 = vld [vmem:[#allocation7 + $0x20] sm:$0xf]  ;;  %v1422_v22 = vld [vmem:[#allocation7 + $0x2c] sm:$0xf0] }
  0x50   : > { %549 = vadd.xlane.f32.xlu0 %v548_v1  ;;  %v1420_v23 = vld [vmem:[#allocation7 + $0x24] sm:$0xf]  ;;  %v1310_v24 = vor.u32 %v1422_v22, %v1309_v21  ;;  %v1311_v25 = vld [vmem:[#allocation7 + $0x30] sm:$0xf0]  ;;  %v1317_v26 = vld [vmem:[#allocation7 + $0x28] sm:$0xf] }
  0x51   : > { %v1423_v27 = vld [vmem:[#allocation7 + $0x34] sm:$0xf0]  ;;  %v1314_v28 = vor.u32 %v1420_v23, %v1311_v25  ;;  %v1421_v30 = vld [vmem:[#allocation7 + $0x2c] sm:$0xf]  ;;  %v1319_v31 = vld [vmem:[#allocation7 + $0x38] sm:$0xf0] }
  0x52   : > { %v1318_v29 = vor.u32 %v1423_v27, %v1317_v26  ;;  %679 = vmatpush.bf16.msra.mxu0 %v1310_v24  ;;  %v1322_v33 = vor.u32 %v1421_v30, %v1319_v31  ;;  %v1293_v35 = vld [vmem:[#allocation7] sm:$0xf]  ;;  %v1418_v36 = vld [vmem:[#allocation7 + $0xc] sm:$0xf0]  ;;  %v1416_v37 = vld [vmem:[#allocation7 + $0x4] sm:$0xf] }
  0x53   : > { %693 = vmatpush.bf16.msra.mxu1 %v1314_v28  ;;  %v1294_v38 = vor.u32 %v1418_v36, %v1293_v35  ;;  %v1295_v39 = vld [vmem:[#allocation7 + $0x10] sm:$0xf0]  ;;  %v1301_v40 = vld [vmem:[#allocation7 + $0x8] sm:$0xf]  ;;  %v1419_v41 = vld [vmem:[#allocation7 + $0x14] sm:$0xf0] }
  0x54   : > { %707 = vmatpush.bf16.msra.mxu2 %v1318_v29  ;;  %721 = vmatpush.bf16.msra.mxu3 %v1322_v33  ;;  %v1298_v43 = vor.u32 %v1416_v37, %v1295_v39  ;;  %v1302_v44 = vor.u32 %v1419_v41, %v1301_v40  ;;  %v1417_v45 = vld [vmem:[#allocation7 + $0xc] sm:$0xf]  ;;  %v1303_v46 = vld [vmem:[#allocation7 + $0x18] sm:$0xf0]  ;;  %v1429_v51 = vld [vmem:[#allocation10 + $0x2c] sm:$0xf] }
  0x55   : > { %v1602_v5 = vpop.eup %1601  ;;  %v1306_v47 = vor.u32 %v1417_v45, %v1303_v46  ;;  %v1353_v49 = vld [vmem:[#allocation10 + $0x28] sm:$0xf]  ;;  %v1431_v50 = vld [vmem:[#allocation10 + $0x34] sm:$0xf0]  ;;  %v1355_v54 = vld [vmem:[#allocation10 + $0x38] sm:$0xf0] }
  0x56   : > { %v555_v6 = vmul.f32 32.0, %v1602_v5  ;;  %vm559_vm1 = vweird.f32 %v1602_v5  ;;  %680 = vmatpush.bf16.msra.mxu0 %v1294_v38  ;;  %v1354_v53 = vor.u32 %v1431_v50, %v1353_v49  ;;  %v1345_v55 = vld [vmem:[#allocation10 + $0x20] sm:$0xf]  ;;  %v1430_v56 = vld [vmem:[#allocation10 + $0x2c] sm:$0xf0]  ;;  %v1358_v57 = vor.u32 %v1429_v51, %v1355_v54  ;;  %s2256_s29 = sshll.u32 %s2206_s3, 5 }
  0x57   : > { %694 = vmatpush.bf16.msra.mxu1 %v1298_v43  ;;  %v1346_v58 = vor.u32 %v1430_v56, %v1345_v55  ;;  %v1428_v59 = vld [vmem:[#allocation10 + $0x24] sm:$0xf]  ;;  %v1347_v60 = vld [vmem:[#allocation10 + $0x30] sm:$0xf0]  ;;  %v1337_v61 = vld [vmem:[#allocation10 + $0x8] sm:$0xf] }
  0x58   : > { %552 = vadd.xlane.f32.xlu0 %v551_v3  ;;  %v556_v7 = vsub.f32 1.0, %v555_v6  ;;  %708 = vmatpush.bf16.msra.mxu2 %v1302_v44  ;;  %v1427_v1 = vld [vmem:[#allocation10 + $0x14] sm:$0xf0]  ;;  %v1329_v6 = vld [vmem:[#allocation10] sm:$0xf]  ;;  %s1440_s1 = sshll.u32 %s1971_s20, 3 }
  0x59   : > { %722 = vmatpush.bf16.msra.mxu3 %v1306_v47  ;;  %v1338_v4 = vor.u32 %v1427_v1, %v1337_v61  ;;  %v1599_v25 = vld [vmem:[#allocation5] ss:$0 sm:$0xff]  ;;  %v1389_v33 = vld [vmem:[#allocation11 + $0x28] sm:$0xf]  ;;  %v1437_v35 = vld [vmem:[#allocation11 + $0x2c] sm:$0xf] }
  0x5a   : > { %v557_v8 = vmul.f32 %v1602_v5, %v556_v7  ;;  %793 = vmatpush.bf16.msrb.mxu0 %v1346_v58  ;;  %v1426_v7 = vld [vmem:[#allocation10 + $0xc] sm:$0xf0]  ;;  %v1600_v29 = vld [vmem:[%s2393_s2] ss:$0 sm:$0xff]  ;;  %v1391_v36 = vld [vmem:[#allocation11 + $0x38] sm:$0xf0] }
  0x5b   : > { %v1381_v37 = vld [vmem:[#allocation11 + $0x20] sm:$0xf]  ;;  %v1436_v40 = vld [vmem:[#allocation11 + $0x24] sm:$0xf]  ;;  %v1383_v41 = vld [vmem:[#allocation11 + $0x30] sm:$0xf0]  ;;  %v1394_v44 = vor.u32 %v1437_v35, %v1391_v36 }
  0x5c   : > { %v558_v9 = vadd.f32 %v1602_v5, %v557_v8  ;;  %821 = vmatpush.bf16.msrb.mxu2 %v1354_v53  ;;  %v1373_v45 = vld [vmem:[#allocation11 + $0x8] sm:$0xf]  ;;  %v1435_v46 = vld [vmem:[#allocation11 + $0x14] sm:$0xf0]  ;;  %v1433_v49 = vld [vmem:[#allocation11 + $0xc] sm:$0xf] }
  0x5d   : > { %835 = vmatpush.bf16.msrb.mxu3 %v1358_v57  ;;  %v1365_v50 = vld [vmem:[#allocation11] sm:$0xf]  ;;  %v1434_v51 = vld [vmem:[#allocation11 + $0xc] sm:$0xf0]  ;;  %v1367_v53 = vld [vmem:[#allocation11 + $0x10] sm:$0xf0]  ;;  %v1374_v54 = vor.u32 %v1435_v46, %v1373_v45 }
  0x5e   : > { %v560_v10 = vsel %vm559_vm1, %v1602_v5, %v558_v9  ;;  %v1339_v5 = vld [vmem:[#allocation10 + $0x18] sm:$0xf0]  ;;  %v1330_v9 = vor.u32 %v1426_v7, %v1329_v6  ;;  %v1366_v56 = vor.u32 %v1434_v51, %v1365_v50  ;;  %s1404_s12 = sshll.u32 %s1975_s21, 4  ;;  %s2261_s16 = scalar_lea.vmem [#allocation14], %s2256_s29 }
  0x5f   : > { %v620_v58 = vld [vmem:[#allocation8] sm:$0xf]  ;;  %s1004_s26 = sadd.s32 %s1440_s1, %s1404_s12  ;;  %s2435_s21 = sld [smem:[#allocation31_spill]] }
  0x60   : > { %822 = vmatpush.bf16.msrb.mxu2 %v1338_v4  ;;  %794 = vmatpush.bf16.msrb.mxu0 %v1330_v9  ;;  %s2269_s13 = sshll.u32 %s1004_s26, 2  ;;  %s2436_s10 = sld [smem:[#allocation34_spill]] }
  0x61   : > { %s1007_s15 = sshll.u32 %s2261_s16, 4  ;;  %s2289_s7 = scalar_lea.vmem [#allocation15], %s2256_s29  ;;  %s2282_s15 = int_to_ptr.vmem [resolvable:$true] %s1007_s15 }
  0x62   : > { %s982_s9 = scalar_lea.sflag [#allocation4], %s2206_s3 }
  0x66   : > { %s1006_s11 = scalar_lea.hbm %s2436_s10, %s2269_s13 }
  0x67   : > { %s2280_s5 = sshll.u32 %s1006_s11, 4  ;;  %s1010_s5 = int_to_ptr.hbm [resolvable:$true] %s2280_s5 }
  0x68   : > { %s1831_s8 = sshra.s32 %s1010_s5, 4  ;;  %s1832_s8 = int_to_ptr.hbm [resolvable:$true] %s1831_s8 }
  0x69   : > { %s1833_s22 = scalar_lea.hbm %s1832_s8, 32  ;;  %p1838_p9 = scmp.lt.s32.totalorder %s1832_s8, %s2436_s10 }
  0x6a   : > { %p1834_p1 = scmp.ne.s32.totalorder %s1832_s8, %s1833_s22 }
  0x6c   : > { %p1835_p3 = pnand %p1834_p1, %p2177_p0 }
  0x6e   : > { %p1836_p8 = pneg %p1835_p3 }
  0xc3   : > { %v550_v11 = vpop.xlane.xlu0 %549 }
  0xc4   : > { %v561_v12 = vmul.f32 %v560_v10, %v550_v11  ;;  %v1331_v11 = vld [vmem:[#allocation10 + $0x10] sm:$0xf0] }
  0xc6   : > { %v2228_v13 = vsub.f32 %v545_v0, %v561_v12  ;;  %v1350_v0 = vor.u32 %v1428_v59, %v1347_v60  ;;  %v622_v59 = vperm.slane %v620_v58, 0  ;;  %v623_v60 = vperm.slane %v620_v58, 1 }
  0xc8   : > { %v565_v14 = vmul.f32 %v2228_v13, %v2228_v13  ;;  %807 = vmatpush.bf16.msrb.mxu1 %v1350_v0 }
  0xca   : > { %v567_v15 = vsel %vm547_vm0, %v565_v14, 0.0 }
  0xcb   : > { %568 = vadd.xlane.f32.xlu1 %v567_v15  ;;  %v553_v16 = vpop.xlane.xlu0 %552 }
  0xcc   : > { %v562_v17 = vmul.f32 %v560_v10, %v553_v16 }
  0xce   : > { %v2233_v18 = vsub.f32 %v546_v2, %v562_v17  ;;  %v1425_v2 = vld [vmem:[#allocation10 + $0xc] sm:$0xf] }
  0xcf   : > { %v1342_v8 = vor.u32 %v1425_v2, %v1339_v5  ;;  %v624_v2 = vperm.slane %v620_v58, 2 }
  0xd0   : > { %v566_v19 = vmul.f32 %v2233_v18, %v2233_v18 }
  0xd1   : > { %836 = vmatpush.bf16.msrb.mxu3 %v1342_v8 }
  0xd2   : > { %v570_v20 = vsel %vm547_vm0, %v566_v19, 0.0 }
  0xd3   : > { %571 = vadd.xlane.f32.xlu1 %v570_v20 }
 0x13e   : > { %v569_v32 = vpop.xlane.xlu1 %568 }
 0x13f   : > { %v573_v34 = vmul.f32 %v569_v32, %v560_v10 }
 0x141   : > { %v575_v42 = vadd.f32 1e-09, %v573_v34  ;;  %v1439_v34 = vld [vmem:[#allocation11 + $0x34] sm:$0xf0] }
 0x142   : > { %v1390_v43 = vor.u32 %v1439_v34, %v1389_v33 }
 0x143   : > { %1603 = vrsqrt.f32 %v575_v42  ;;  %vm583_vm3 = vweird.f32 %v575_v42 }
 0x146   : > { %v572_v48 = vpop.xlane.xlu1 %571 }
 0x147   : > { %v574_v52 = vmul.f32 %v572_v48, %v560_v10  ;;  %v1424_v10 = vld [vmem:[#allocation10 + $0x4] sm:$0xf]  ;;  %v1386_v48 = vor.u32 %v1436_v40, %v1383_v41 }
 0x148   : > { %v1334_v14 = vor.u32 %v1424_v10, %v1331_v11 }
 0x149   : > { %v1604_v62 = vpop.eup %1603  ;;  %v576_v63 = vadd.f32 1e-09, %v574_v52  ;;  %v1432_v52 = vld [vmem:[#allocation11 + $0x4] sm:$0xf] }
 0x14a   : > { %v578_v3 = vmul.f32 %v1604_v62, %v575_v42  ;;  %808 = vmatpush.bf16.msrb.mxu1 %v1334_v14  ;;  %vm584_vm2 = vweird.f32 %v1604_v62  ;;  %v1370_v57 = vor.u32 %v1432_v52, %v1367_v53  ;;  %v2267_v14 = vld [vmem:[%s2435_s21] sm:$0xf] }
 0x14b   : > { %1605 = vrsqrt.f32 %v576_v63  ;;  %vm585_vm4 = vmor %vm583_vm3, %vm584_vm2  ;;  %vm593_vm6 = vweird.f32 %v576_v63 }
 0x14c   : > { %v579_v12 = vmul.f32 %v1604_v62, %v578_v3  ;;  %v625_v3 = vperm.slane %v620_v58, 3 }
 0x14e   : > { %v580_v15 = vmul.f32 0.5, %v579_v12 }
 0x150   : > { %v581_v16 = vsub.f32 1.5, %v580_v15 }
 0x151   : > { %v1606_v17 = vpop.eup %1605 }
 0x152   : > { %v582_v19 = vmul.f32 %v1604_v62, %v581_v16  ;;  %v588_v20 = vmul.f32 %v1606_v17, %v576_v63  ;;  %vm594_vm5 = vweird.f32 %v1606_v17  ;;  %v739_v16 = vperm.slane %v2267_v14, 0 }
 0x153   : > { %vm595_vm7 = vmor %vm593_vm6, %vm594_vm5 }
 0x154   : > { %v589_v21 = vmul.f32 %v1606_v17, %v588_v20  ;;  %v586_v22 = vsel %vm585_vm4, %v1604_v62, %v582_v19 }
 0x155   : > { %v597_v26 = vmul.f32 %v586_v22, %v2228_v13  ;;  %v1438_v13 = vld [vmem:[#allocation11 + $0x2c] sm:$0xf0] }
 0x156   : > { %v590_v23 = vmul.f32 0.5, %v589_v21  ;;  %v1382_v47 = vor.u32 %v1438_v13, %v1381_v37 }
 0x157   : > { %v603_v30 = vmul.f32 %v1599_v25, %v597_v26 }
 0x158   : > { %v591_v24 = vsub.f32 1.5, %v590_v23 }
 0x159   : > { %v609_v38 = vadd.f32 %v1600_v29, %v603_v30  ;;  %v742_v30 = vperm.slane %v2267_v14, 3 }
 0x15a   : > { %v592_v27 = vmul.f32 %v1606_v17, %v591_v24 }
 0x15c   : > { %v596_v28 = vsel %vm595_vm7, %v1606_v17, %v592_v27  ;;  %v740_v17 = vperm.slane %v2267_v14, 1 }
 0x15d   : > { %v598_v31 = vmul.f32 %v596_v28, %v2233_v18  ;;  %v1375_v18 = vld [vmem:[#allocation11 + $0x18] sm:$0xf0] }
 0x15e   : > { %v1378_v55 = vor.u32 %v1433_v49, %v1375_v18 }
 0x15f   : > { %v604_v32 = vmul.f32 %v1599_v25, %v598_v31 }
 0x161   : > { %v610_v39 = vadd.f32 %v1600_v29, %v604_v32  ;;  %v741_v29 = vperm.slane %v2267_v14, 2 }
 0x163   : > { %v611_v42 = vpack.c.bf16 %v610_v39, %v609_v38 }
 0x165   : > { %1323 = vmatmul.msk.bf16.vlgmr.msra.gmra.mxu0 %vm547_vm0, %v611_v42  ;;  %1324 = vmatmul.msk.bf16.vlgmr.msra.gmra.mxu1 %vm547_vm0, %v611_v42 }
 0x166   : > { %1325 = vmatmul.msk.bf16.vlgmr.msra.gmra.mxu2 %vm547_vm0, %v611_v42  ;;  %1326 = vmatmul.msk.bf16.vlgmr.msra.gmra.mxu3 %vm547_vm0, %v611_v42 }
 0x167   : > { %935 = vmatpush.bf16.msra.mxu2 %v1390_v43  ;;  %949 = vmatpush.bf16.msra.mxu3 %v1394_v44 }
 0x168   : > { %907 = vmatpush.bf16.msra.mxu0 %v1382_v47  ;;  %921 = vmatpush.bf16.msra.mxu1 %v1386_v48 }
 0x16b   : > { %936 = vmatpush.bf16.msra.mxu2 %v1374_v54  ;;  %950 = vmatpush.bf16.msra.mxu3 %v1378_v55 }
 0x16c   : > { %908 = vmatpush.bf16.msra.mxu0 %v1366_v56  ;;  %922 = vmatpush.bf16.msra.mxu1 %v1370_v57 }
 0x175   : > { %1359 = vmatmul.msk.bf16.vlgmr.msrb.gmra.mxu0 %vm547_vm0, %v611_v42  ;;  %1360 = vmatmul.msk.bf16.vlgmr.msrb.gmra.mxu1 %vm547_vm0, %v611_v42 }
 0x176   : > { %1361 = vmatmul.msk.bf16.vlgmr.msrb.gmra.mxu2 %vm547_vm0, %v611_v42  ;;  %1362 = vmatmul.msk.bf16.vlgmr.msrb.gmra.mxu3 %vm547_vm0, %v611_v42 }
 0x185   : > { %1395 = vmatmul.msk.bf16.vlgmr.msra.gmra.mxu0 %vm547_vm0, %v611_v42  ;;  %1396 = vmatmul.msk.bf16.vlgmr.msra.gmra.mxu1 %vm547_vm0, %v611_v42 }
 0x186   : > { %1397 = vmatmul.msk.bf16.vlgmr.msra.gmra.mxu2 %vm547_vm0, %v611_v42  ;;  %1398 = vmatmul.msk.bf16.vlgmr.msra.gmra.mxu3 %vm547_vm0, %v611_v42 }
 0x1e2   : > { %v682_v61 = vpop.f32.mrf.mxu0  ;;  %v696_v62 = vpop.f32.mrf.mxu1 }
 0x1e3   : > { %v683_v63 = vadd.f32 %v682_v61, %v622_v59  ;;  %v697_v0 = vadd.f32 %v696_v62, %v623_v60 }
 0x1e5   : > { %v957_v1 = vpack.c.bf16 %v697_v0, %v683_v63 }
 0x1e7   : > { %961 = vst [vmem:[%s2261_s16] sm:$0xff] %v957_v1 }
 0x1e9   : > { %v710_v4 = vpop.f32.mrf.mxu2  ;;  %v724_v5 = vpop.f32.mrf.mxu3 }
 0x1ea   : > { %v711_v6 = vadd.f32 %v710_v4, %v624_v2  ;;  %v725_v7 = vadd.f32 %v724_v5, %v625_v3  ;;  %v684_v8 = vpop.f32.mrf.mxu0  ;;  %v698_v9 = vpop.f32.mrf.mxu1 }
 0x1eb   : > { %v685_v10 = vadd.f32 %v684_v8, %v622_v59  ;;  %v699_v11 = vadd.f32 %v698_v9, %v623_v60 }
 0x1ec   : > { %v958_v12 = vpack.c.bf16 %v725_v7, %v711_v6 }
 0x1ed   : > { %v959_v15 = vpack.c.bf16 %v699_v11, %v685_v10 }
 0x1ee   : > { %962 = vst [vmem:[%s2261_s16 + $0x8] sm:$0xff] %v958_v12 }
 0x1ef   : > { %963 = vst [vmem:[%s2261_s16 + $0x10] sm:$0xff] %v959_v15 }
 0x1f1   : > { %v712_v19 = vpop.f32.mrf.mxu2  ;;  %v726_v20 = vpop.f32.mrf.mxu3 }
 0x1f2   : > { %v713_v21 = vadd.f32 %v712_v19, %v624_v2  ;;  %v727_v22 = vadd.f32 %v726_v20, %v625_v3  ;;  %v796_v23 = vpop.f32.mrf.mxu0  ;;  %v810_v24 = vpop.f32.mrf.mxu1 }
 0x1f3   : > { %v797_v25 = vadd.f32 %v796_v23, %v739_v16  ;;  %v811_v26 = vadd.f32 %v810_v24, %v740_v17 }
 0x1f4   : > { %v960_v27 = vpack.c.bf16 %v727_v22, %v713_v21 }
 0x1f5   : > { %v965_v28 = vpack.c.bf16 %v811_v26, %v797_v25 }
 0x1f6   : > { %964 = vst [vmem:[%s2261_s16 + $0x18] sm:$0xff] %v960_v27  ;;  %s1837_s16 = scalar_lea.hbm %s2436_s10, 128 }
 0x1f7   : > { %969 = vst [vmem:[%s2289_s7] sm:$0xff] %v965_v28  ;;  %p1839_p10 = scmp.lt.s32.totalorder %s1837_s16, %s1833_s22 }
 0x1f9   : > { %p1840_p11 = por %p1839_p10, %p1838_p9 }
 0x1fb   : > { %p1841_p12 = pnand %p1840_p11, %p1836_p8 }
 0x1fd   : > { %1844 = shalt.err (!%p1841_p12)
}
 0x1fe   : > { %s2000_s3 = smov 256   ;;  %s2001_s20 = smov 16   ;;  %v824_v31 = vpop.f32.mrf.mxu2  ;;  %v838_v32 = vpop.f32.mrf.mxu3  ;;  %v851_v13 = vld [vmem:[#allocation13] sm:$0xf] }
 0x1ff   : > { %1469 = dma.vmem_to_hbm [thread:$0]  (%p2177_p0), %s2282_s15, 512, %s1010_s5, %s982_s9, %s2000_s3, %s2000_s3, %s2001_s20   ;;  %v825_v33 = vadd.f32 %v824_v31, %v741_v29  ;;  %v839_v34 = vadd.f32 %v838_v32, %v742_v30  ;;  %v798_v35 = vpop.f32.mrf.mxu0  ;;  %v812_v36 = vpop.f32.mrf.mxu1  ;;  %v853_v41 = vperm.slane %v851_v13, 0  ;;  %v854_v42 = vperm.slane %v851_v13, 1 }
 0x200   : > { %v799_v37 = vadd.f32 %v798_v35, %v739_v16  ;;  %v813_v38 = vadd.f32 %v812_v36, %v740_v17  ;;  %s2437_s6 = sld [smem:[#allocation35_spill]]  ;;  %s1027_s15 = sshll.u32 %s2289_s7, 4  ;;  %v855_v52 = vperm.slane %v851_v13, 2  ;;  %v856_v53 = vperm.slane %v851_v13, 3  ;;  %s1028_s15 = int_to_ptr.vmem [resolvable:$true] %s1027_s15 }
 0x201   : > { %v966_v39 = vpack.c.bf16 %v839_v34, %v825_v33  ;;  %s986_s5 = sand.u32 1, %s2103_s25   ;;  %s2320_s8 = scalar_lea.vmem [#allocation17], %s2256_s29 }
 0x202   : > { %v967_v40 = vpack.c.bf16 %v813_v38, %v799_v37  ;;  %s2323_s22 = scalar_lea.sflag [#allocation16], %s986_s5 }
 0x203   : > { %970 = vst [vmem:[%s2289_s7 + $0x8] sm:$0xff] %v966_v39 }
 0x204   : > { %971 = vst [vmem:[%s2289_s7 + $0x10] sm:$0xff] %v967_v40 }
 0x206   : > { %s1026_s11 = scalar_lea.hbm %s2437_s6, %s2269_s13  ;;  %v826_v43 = vpop.f32.mrf.mxu2  ;;  %v840_v44 = vpop.f32.mrf.mxu3  ;;  %s1865_s26 = scalar_lea.hbm %s2437_s6, 128 }
 0x207   : > { %v827_v45 = vadd.f32 %v826_v43, %v741_v29  ;;  %v841_v46 = vadd.f32 %v840_v44, %v742_v30  ;;  %v910_v47 = vpop.f32.mrf.mxu0  ;;  %v924_v48 = vpop.f32.mrf.mxu1  ;;  %s2315_s9 = sshll.u32 %s1026_s11, 4  ;;  %s1030_s9 = int_to_ptr.hbm [resolvable:$true] %s2315_s9 }
 0x208   : > { %v911_v49 = vadd.f32 %v910_v47, %v853_v41  ;;  %v925_v18 = vadd.f32 %v924_v48, %v854_v42  ;;  %s1859_s25 = sshra.s32 %s1030_s9, 4  ;;  %s1860_s25 = int_to_ptr.hbm [resolvable:$true] %s1859_s25 }
 0x209   : > { %v968_v50 = vpack.c.bf16 %v841_v46, %v827_v45  ;;  %s1861_s1 = scalar_lea.hbm %s1860_s25, 32  ;;  %p1866_p5 = scmp.lt.s32.totalorder %s1860_s25, %s2437_s6 }
 0x20a   : > { %v973_v51 = vpack.c.bf16 %v925_v18, %v911_v49  ;;  %p1862_p13 = scmp.ne.s32.totalorder %s1860_s25, %s1861_s1  ;;  %p1867_p7 = scmp.lt.s32.totalorder %s1865_s26, %s1861_s1 }
 0x20b   : > { %972 = vst [vmem:[%s2289_s7 + $0x18] sm:$0xff] %v968_v50 }
 0x20c   : > { %977 = vst [vmem:[%s2320_s8] sm:$0xff] %v973_v51  ;;  %p1863_p2 = pnand %p1862_p13, %p2177_p0  ;;  %p1868_p1 = por %p1867_p7, %p1866_p5 }
 0x20e   : > { %p1864_p4 = pneg %p1863_p2 }
 0x210   : > { %p1869_p3 = pnand %p1868_p1, %p1864_p4 }
 0x212   : > { %1872 = shalt.err (!%p1869_p3)
}
 0x213   : > { %1470 = dma.vmem_to_hbm [thread:$0]  (%p2177_p0), %s1028_s15, 512, %s1030_s9, %s2323_s22, %s2000_s3, %s2000_s3, %s2001_s20   ;;  %v938_v54 = vpop.f32.mrf.mxu2  ;;  %v952_v55 = vpop.f32.mrf.mxu3 }
 0x214   : > { %v939_v56 = vadd.f32 %v938_v54, %v855_v52  ;;  %v953_v57 = vadd.f32 %v952_v55, %v856_v53  ;;  %v912_v58 = vpop.f32.mrf.mxu0  ;;  %v926_v59 = vpop.f32.mrf.mxu1  ;;  %s2438_s28 = sld [smem:[#allocation36_spill]]  ;;  %s1047_s5 = sshll.u32 %s2320_s8, 4  ;;  %s1048_s5 = int_to_ptr.vmem [resolvable:$true] %s1047_s5 }
 0x215   : > { %v913_v60 = vadd.f32 %v912_v58, %v853_v41  ;;  %v927_v61 = vadd.f32 %v926_v59, %v854_v42 }
 0x216   : > { %v974_v62 = vpack.c.bf16 %v953_v57, %v939_v56 }
 0x217   : > { %v975_v63 = vpack.c.bf16 %v927_v61, %v913_v60 }
 0x218   : > { %978 = vst [vmem:[%s2320_s8 + $0x8] sm:$0xff] %v974_v62 }
 0x219   : > { %979 = vst [vmem:[%s2320_s8 + $0x10] sm:$0xff] %v975_v63 }
 0x21a   : > { %s1046_s11 = scalar_lea.hbm %s2438_s28, %s2269_s13  ;;  %s1893_s12 = scalar_lea.hbm %s2438_s28, 128 }
 0x21b   : > { %v940_v0 = vpop.f32.mrf.mxu2  ;;  %v954_v1 = vpop.f32.mrf.mxu3  ;;  %s1049_s15 = sshll.u32 %s1046_s11, 4  ;;  %s1050_s15 = int_to_ptr.hbm [resolvable:$true] %s1049_s15 }
 0x21c   : > { %v941_v2 = vadd.f32 %v940_v0, %v855_v52  ;;  %v955_v3 = vadd.f32 %v954_v1, %v856_v53  ;;  %s1887_s9 = sshra.s32 %s1050_s15, 4  ;;  %s1888_s9 = int_to_ptr.hbm [resolvable:$true] %s1887_s9 }
 0x21d   : > { %s1889_s25 = scalar_lea.hbm %s1888_s9, 32  ;;  %p1894_p11 = scmp.lt.s32.totalorder %s1888_s9, %s2438_s28 }
 0x21e   : > { %v976_v4 = vpack.c.bf16 %v955_v3, %v941_v2  ;;  %p1890_p8 = scmp.ne.s32.totalorder %s1888_s9, %s1889_s25  ;;  %p1895_p12 = scmp.lt.s32.totalorder %s1893_s12, %s1889_s25 }
 0x220   : > { %980 = vst [vmem:[%s2320_s8 + $0x18] sm:$0xff] %v976_v4  ;;  %p1891_p9 = pnand %p1890_p8, %p2177_p0  ;;  %p1896_p13 = por %p1895_p12, %p1894_p11 }
 0x222   : > { %p1892_p10 = pneg %p1891_p9 }
 0x224   : > { %p1897_p2 = pnand %p1896_p13, %p1892_p10 }
 0x226   : > { %1900 = shalt.err (!%p1897_p2)
}
 0x227   : > { %1471 = dma.vmem_to_hbm [thread:$0]  (%p2177_p0), %s1048_s5, 512, %s1050_s15, %s2323_s22, %s2000_s3, %s2000_s3, %s2001_s20  }
 0x228 PF: > { %p1521_p4 = scmp.ge.s32.totalorder %s1987_s24, 2  ;;  %s1064_s8 = sand.u32 1, %s1959_s17  }
 0x229   : > { %s1065_s7 = scalar_lea.sflag [#allocation4], %s1064_s8 }
 0x22a   : > { %p1499_p5 = pnand %p1521_p4, %p2186_p6 }
 0x22c   : > { %p1500_p7 = pneg %p1499_p5 }
 0x22e   : > { %1950 = dma.done.wait (%p1500_p7), %s1065_s7, 512  }
 0x22f   : > { %1952 = vsyncadd (%p1500_p7), %s1065_s7, 4294966784  ;;  %s2439_s30 = sadd.s32 4294967294, %s1987_s24  }
 0x230   : > { %s1074_s27 = sand.u32 1, %s2439_s30  }
 0x231   : > { %s1075_s29 = scalar_lea.sflag [#allocation16], %s1074_s27 }
 0x232   : > { %1954 = dma.done.wait (%p1500_p7), %s1075_s29, 1024  }
 0x233   : > { %1956 = vsyncadd (%p1500_p7), %s1075_s29, 4294966272  ;;  %s34_s24 = sadd.s32 1, %s1987_s24   ;;  %s2440_s20 = sld [smem:[#allocation24_spill]] }
 0x234   : > { %p31_p0 = scmp.ge.s32.totalorder %s34_s24, 6   ;;  %s2441_s22 = sld [smem:[#allocation25_spill]] }
 0x235   : > { %s2442_s4 = sld [smem:[#allocation26_spill]]  ;;  %s2443_s17 = smov %s1963_s18 }
 0x236   : > { %s2444_s18 = smov %s1967_s19  ;;  %s2445_s19 = smov %s2193_s14 }
 0x237   : > { %s2446_s21 = smov %s1983_s23  ;;  %33 = sbr.rel (!%p31_p0) target bundleno = 23 (0x17), region = 157 }
 0x23b   : > { %s2447_s23 = smov %s2442_s4 }
 0x23c   :  { %1091 = vsyncpa [#allocation3], 1 }
 0x23d   :  { %1093 = vsyncpa [#allocation3 + $0x1], 1 }
 0x23e   :  { %1094 = vsyncpa [#allocation6], 1 }
 0x23f   :  { %1095 = vsyncpa [#allocation9], 1 }
 0x240   :  { %1096 = vsyncpa [#allocation12], 1 }
 0x241   :  { %1097 = vsyncpa [#allocation4], 1 }
 0x242   :  { %1099 = vsyncpa [#allocation4 + $0x1], 1 }
 0x243   :  { %1100 = vsyncpa [#allocation16], 1 }
 0x244   :  { %1102 = vsyncpa [#allocation16 + $0x1], 1 }

</bundles_post_ra>
